<compile_context>
chip_gen: v6e
topology: v6e:2x2x1
jax: 0.10.0
libtpu: 0.0.40
codegen_flags: <defaults>
</compile_context>

<pallas_src>
import functools

import jax
import jax.numpy as jnp
import numpy as np
from jax.experimental import pallas as pl
from jax.experimental.pallas import tpu as pltpu


def _conv_lrelu_kernel(x_ref, w_ref, o_ref, p_ref, *, nb, ksize_h, ksize_w,
                       wp, cin_pad, l_acc, win_w, negative_slope):
    # x_ref : (Nb, Cin_pad, L_in)       flattened zero-padded NCHW images (VMEM)
    # w_ref : (Cout, KH*KW*Cin_pad)     pre-reshaped weight (VMEM)
    # o_ref : (Nb, Cout, L_acc)         flattened outputs on the (Hout, Wp) grid
    # p_ref : (KH*KW*Cin_pad, Nb*L_acc) VMEM scratch: stacked shifted patches

    # Build the stacked patch matrix for all Nb images in this block.
    for b in range(nb):
        img = x_ref[b]                         # (Cin_pad, L_in), one load/image
        col0 = b * l_acc
        for th in range(ksize_h):
            # One row-window per kernel row; the ksize_w taps are lane-shifted
            # value slices of it (load reuse) instead of independent misaligned
            # VMEM loads.
            row = img[:, th * wp: th * wp + win_w]   # (Cin_pad, L_acc + KW - 1)
            for tw in range(ksize_w):
                t = th * ksize_w + tw
                p_ref[t * cin_pad:(t + 1) * cin_pad, col0:col0 + l_acc] = (
                    row[:, tw:tw + l_acc])

    # One fused MXU contraction over K = KH*KW*Cin_pad for all Nb images.
    acc = jnp.dot(w_ref[...], p_ref[...], preferred_element_type=jnp.float32)

    # LeakyReLU(negative_slope) on the f32 accumulator, lane-dense stores.
    y = jnp.where(acc >= 0, acc, negative_slope * acc).astype(o_ref.dtype)
    for b in range(nb):
        o_ref[b] = y[:, b * l_acc:(b + 1) * l_acc]


def conv_block_leaky_relu(x_nchw, weight_oihw, *, stride=1, padding=1,
                          negative_slope=0.1, batch_block=None,
                          operand_dtype=None):
    """Pallas equivalent of nn.Conv2d(bias=False) + LeakyReLU(negative_slope).

    x_nchw      : (N, Cin, H, W)       -- PyTorch NCHW input
    weight_oihw : (Cout, Cin, KH, KW)  -- PyTorch conv weight layout
    batch_block : images folded into one grid step (None -> auto, VMEM-capped)
    operand_dtype: matmul operand dtype (e.g. jnp.bfloat16 fast path on
                   v6e/v7x); accumulation is always f32.  Default: x dtype.
    returns     : (N, Cout, Hout, Wout)
    """
    n, cin, h, w = x_nchw.shape
    cout, cin_w, ksize_h, ksize_w = weight_oihw.shape
    assert cin == cin_w
    assert stride == 1, "only stride=1 is implemented"

    op_dtype = jnp.dtype(operand_dtype) if operand_dtype is not None \
        else jnp.dtype(x_nchw.dtype)
    itemsize = op_dtype.itemsize
    out_itemsize = jnp.dtype(x_nchw.dtype).itemsize
    # Full sublane band per operand dtype (f32 -> 8, bf16 -> 16, int8 -> 32).
    sub = 8 * max(1, 4 // itemsize)

    hp = h + 2 * padding
    wp = w + 2 * padding
    h_out = hp - ksize_h + 1
    w_out = wp - ksize_w + 1

    # Flattened accumulation grid: (Hout rows) x (Wp columns); columns >= Wout
    # pick up cross-row "wrap" reads and are sliced off at the end.
    l_acc = h_out * wp
    win_w = l_acc + ksize_w - 1

    cin_pad = -(-cin // sub) * sub
    k_tot = ksize_h * ksize_w * cin_pad

    # Flat input must cover (largest tap offset) + L_acc elements.
    needed = (ksize_h - 1) * wp + (ksize_w - 1) + l_acc
    extra_rows = max(0, -(-(needed - hp * wp) // wp))
    l_in = (hp + extra_rows) * wp

    def vmem_need(nb):
        blk_in = nb * cin_pad * l_in * itemsize
        blk_out = nb * cout * l_acc * out_itemsize
        blk_w = cout * k_tot * itemsize
        scratch = k_tot * nb * l_acc * itemsize
        return 2 * (blk_in + blk_out + blk_w) + scratch   # double-buffered I/O

    if batch_block is None:
        budget = 24 * 1024 * 1024          # portable: under v7x scoped default
        nb = 1
        for cand in range(1, n + 1):
            if n % cand == 0 and vmem_need(cand) <= budget:
                nb = cand
    else:
        nb = max(1, min(int(batch_block), n))
        while n % nb:
            nb -= 1
    grid = n // nb

    # One pad (channel pad + spatial zero-padding + extra bottom rows), then a
    # free row-major reshape to the flat layout.  No transposes.
    x_pad = jnp.pad(
        x_nchw,
        ((0, 0), (0, cin_pad - cin),
         (padding, padding + extra_rows), (padding, padding)))
    x_flat = x_pad.reshape(n, cin_pad, l_in).astype(op_dtype)

    # Weight: OIHW -> (Cout, KH, KW, Cin_pad) -> (Cout, K); tap-major /
    # channel-minor row order matches the scratch band layout.
    w2 = jnp.transpose(weight_oihw, (0, 2, 3, 1))
    w2 = jnp.pad(w2, ((0, 0), (0, 0), (0, 0), (0, cin_pad - cin)))
    w2 = w2.reshape(cout, k_tot).astype(op_dtype)

    kernel = functools.partial(
        _conv_lrelu_kernel,
        nb=nb, ksize_h=ksize_h, ksize_w=ksize_w, wp=wp, cin_pad=cin_pad,
        l_acc=l_acc, win_w=win_w, negative_slope=negative_slope)

    cost = pl.CostEstimate(
        flops=2 * n * cout * k_tot * l_acc,
        transcendentals=0,
        bytes_accessed=(x_flat.size * itemsize + w2.size * itemsize
                        + n * cout * l_acc * out_itemsize))

    vmem_limit = int(min(100 * 1024 * 1024,
                         max(32 * 1024 * 1024, int(vmem_need(nb) * 1.25))))

    out_flat = pl.pallas_call(
        kernel,
        out_shape=jax.ShapeDtypeStruct((n, cout, l_acc), x_nchw.dtype),
        grid_spec=pltpu.PrefetchScalarGridSpec(
            num_scalar_prefetch=0,
            grid=(grid,),
            in_specs=[
                pl.BlockSpec((nb, cin_pad, l_in), lambda i: (i, 0, 0)),
                pl.BlockSpec((cout, k_tot), lambda i: (0, 0)),
            ],
            out_specs=pl.BlockSpec((nb, cout, l_acc), lambda i: (i, 0, 0)),
            scratch_shapes=[pltpu.VMEM((k_tot, nb * l_acc), op_dtype)],
        ),
        compiler_params=pltpu.CompilerParams(
            dimension_semantics=("parallel",),
            vmem_limit_bytes=vmem_limit),
        cost_estimate=cost,
    )(x_flat, w2)

    # Drop the Wp-Wout wrap columns; the reshape is a row-major no-op.
    return out_flat.reshape(n, cout, h_out, wp)[:, :, :, :w_out]


if __name__ == "__main__":
    key = jax.random.PRNGKey(0)
    kx, kw_key = jax.random.split(key)

    N, CIN, COUT, H, W, K = 2, 4, 8, 16, 16, 3
    x = jax.random.normal(kx, (N, CIN, H, W), dtype=jnp.float32)

    # Deterministic weight init (kaiming-uniform-like range, as nn.Conv2d).
    fan_in = CIN * K * K
    bound = float(np.sqrt(1.0 / fan_in))
    weight = jax.random.uniform(kw_key, (COUT, CIN, K, K),
                                dtype=jnp.float32, minval=-bound, maxval=bound)

    run = jax.jit(lambda a, b: conv_block_leaky_relu(
        a, b, stride=1, padding=1, negative_slope=0.1))
    out = jax.block_until_ready(run(x, weight))

    # Reference in plain JAX (same semantics as F.conv2d + leaky_relu).
    ref = jax.lax.conv_general_dilated(
        x, weight, window_strides=(1, 1), padding=((1, 1), (1, 1)),
        dimension_numbers=("NCHW", "OIHW", "NCHW"))
    ref = jnp.where(ref >= 0, ref, 0.1 * ref)

    assert out.shape == (N, COUT, H, W)
    np.testing.assert_allclose(np.asarray(out), np.asarray(ref),
                               rtol=1e-5, atol=1e-5)
    print("KERNEL_OK")
</pallas_src>

<mosaic_0001>
module attributes {stable_mosaic.version = 11 : i64} {
  func.func @_conv_lrelu_kernel(%arg0: i32, %arg1: memref<2x8x342xf32, #tpu.memory_space<vmem>>, %arg2: memref<8x72xf32, #tpu.memory_space<vmem>>, %arg3: memref<2x8x288xf32, #tpu.memory_space<vmem>>, %arg4: memref<72x576xf32, #tpu.memory_space<vmem>>) attributes {dimension_semantics = [#tpu.dimension_semantics<parallel>], iteration_bounds = array<i64: 1>, scalar_prefetch = 0 : i64, scratch_operands = 1 : i64, tpu.core_type = #tpu.core_type<tc>, window_params = [{transform_indices = @transform_0, window_bounds = array<i64: 2, 8, 342>}, {pipeline_mode = #tpu.pipeline_mode<synchronous>, transform_indices = @transform_1, window_bounds = array<i64: 8, 72>}, {transform_indices = @transform_2, window_bounds = array<i64: 2, 8, 288>}]} {
    %c0 = arith.constant 0 : index
    %c0_0 = arith.constant 0 : index
    %c0_1 = arith.constant 0 : index
    %0 = vector.load %arg1[%c0, %c0_0, %c0_1] : memref<2x8x342xf32, #tpu.memory_space<vmem>>, vector<1x8x342xf32>
    %1 = vector.shape_cast %0 : vector<1x8x342xf32> to vector<8x342xf32>
    %2 = vector.extract_strided_slice %1 {offsets = [0, 0], sizes = [8, 290], strides = [1, 1]} : vector<8x342xf32> to vector<8x290xf32>
    %3 = vector.extract_strided_slice %2 {offsets = [0, 0], sizes = [8, 288], strides = [1, 1]} : vector<8x290xf32> to vector<8x288xf32>
    %c0_2 = arith.constant 0 : index
    %c0_3 = arith.constant 0 : index
    %4 = vector.load %arg4[%c0_2, %c0_3] : memref<72x576xf32, #tpu.memory_space<vmem>>, vector<8x288xf32>
    tpu.vector_store %arg4[%c0_2, %c0_3], %3 {strides = array<i32>} : memref<72x576xf32, #tpu.memory_space<vmem>>, vector<8x288xf32>,
    %5 = vector.extract_strided_slice %2 {offsets = [0, 1], sizes = [8, 288], strides = [1, 1]} : vector<8x290xf32> to vector<8x288xf32>
    %c8 = arith.constant 8 : index
    %c0_4 = arith.constant 0 : index
    %6 = vector.load %arg4[%c8, %c0_4] : memref<72x576xf32, #tpu.memory_space<vmem>>, vector<8x288xf32>
    tpu.vector_store %arg4[%c8, %c0_4], %5 {strides = array<i32>} : memref<72x576xf32, #tpu.memory_space<vmem>>, vector<8x288xf32>,
    %7 = vector.extract_strided_slice %2 {offsets = [0, 2], sizes = [8, 288], strides = [1, 1]} : vector<8x290xf32> to vector<8x288xf32>
    %c16 = arith.constant 16 : index
    %c0_5 = arith.constant 0 : index
    %8 = vector.load %arg4[%c16, %c0_5] : memref<72x576xf32, #tpu.memory_space<vmem>>, vector<8x288xf32>
    tpu.vector_store %arg4[%c16, %c0_5], %7 {strides = array<i32>} : memref<72x576xf32, #tpu.memory_space<vmem>>, vector<8x288xf32>,
    %9 = vector.extract_strided_slice %1 {offsets = [0, 18], sizes = [8, 290], strides = [1, 1]} : vector<8x342xf32> to vector<8x290xf32>
    %10 = vector.extract_strided_slice %9 {offsets = [0, 0], sizes = [8, 288], strides = [1, 1]} : vector<8x290xf32> to vector<8x288xf32>
    %c24 = arith.constant 24 : index
    %c0_6 = arith.constant 0 : index
    %11 = vector.load %arg4[%c24, %c0_6] : memref<72x576xf32, #tpu.memory_space<vmem>>, vector<8x288xf32>
    tpu.vector_store %arg4[%c24, %c0_6], %10 {strides = array<i32>} : memref<72x576xf32, #tpu.memory_space<vmem>>, vector<8x288xf32>,
    %12 = vector.extract_strided_slice %9 {offsets = [0, 1], sizes = [8, 288], strides = [1, 1]} : vector<8x290xf32> to vector<8x288xf32>
    %c32 = arith.constant 32 : index
    %c0_7 = arith.constant 0 : index
    %13 = vector.load %arg4[%c32, %c0_7] : memref<72x576xf32, #tpu.memory_space<vmem>>, vector<8x288xf32>
    tpu.vector_store %arg4[%c32, %c0_7], %12 {strides = array<i32>} : memref<72x576xf32, #tpu.memory_space<vmem>>, vector<8x288xf32>,
    %14 = vector.extract_strided_slice %9 {offsets = [0, 2], sizes = [8, 288], strides = [1, 1]} : vector<8x290xf32> to vector<8x288xf32>
    %c40 = arith.constant 40 : index
    %c0_8 = arith.constant 0 : index
    %15 = vector.load %arg4[%c40, %c0_8] : memref<72x576xf32, #tpu.memory_space<vmem>>, vector<8x288xf32>
    tpu.vector_store %arg4[%c40, %c0_8], %14 {strides = array<i32>} : memref<72x576xf32, #tpu.memory_space<vmem>>, vector<8x288xf32>,
    %16 = vector.extract_strided_slice %1 {offsets = [0, 36], sizes = [8, 290], strides = [1, 1]} : vector<8x342xf32> to vector<8x290xf32>
    %17 = vector.extract_strided_slice %16 {offsets = [0, 0], sizes = [8, 288], strides = [1, 1]} : vector<8x290xf32> to vector<8x288xf32>
    %c48 = arith.constant 48 : index
    %c0_9 = arith.constant 0 : index
    %18 = vector.load %arg4[%c48, %c0_9] : memref<72x576xf32, #tpu.memory_space<vmem>>, vector<8x288xf32>
    tpu.vector_store %arg4[%c48, %c0_9], %17 {strides = array<i32>} : memref<72x576xf32, #tpu.memory_space<vmem>>, vector<8x288xf32>,
    %19 = vector.extract_strided_slice %16 {offsets = [0, 1], sizes = [8, 288], strides = [1, 1]} : vector<8x290xf32> to vector<8x288xf32>
    %c56 = arith.constant 56 : index
    %c0_10 = arith.constant 0 : index
    %20 = vector.load %arg4[%c56, %c0_10] : memref<72x576xf32, #tpu.memory_space<vmem>>, vector<8x288xf32>
    tpu.vector_store %arg4[%c56, %c0_10], %19 {strides = array<i32>} : memref<72x576xf32, #tpu.memory_space<vmem>>, vector<8x288xf32>,
    %21 = vector.extract_strided_slice %16 {offsets = [0, 2], sizes = [8, 288], strides = [1, 1]} : vector<8x290xf32> to vector<8x288xf32>
    %c64 = arith.constant 64 : index
    %c0_11 = arith.constant 0 : index
    %22 = vector.load %arg4[%c64, %c0_11] : memref<72x576xf32, #tpu.memory_space<vmem>>, vector<8x288xf32>
    tpu.vector_store %arg4[%c64, %c0_11], %21 {strides = array<i32>} : memref<72x576xf32, #tpu.memory_space<vmem>>, vector<8x288xf32>,
    %c1 = arith.constant 1 : index
    %c0_12 = arith.constant 0 : index
    %c0_13 = arith.constant 0 : index
    %23 = vector.load %arg1[%c1, %c0_12, %c0_13] : memref<2x8x342xf32, #tpu.memory_space<vmem>>, vector<1x8x342xf32>
    %24 = vector.shape_cast %23 : vector<1x8x342xf32> to vector<8x342xf32>
    %25 = vector.extract_strided_slice %24 {offsets = [0, 0], sizes = [8, 290], strides = [1, 1]} : vector<8x342xf32> to vector<8x290xf32>
    %26 = vector.extract_strided_slice %25 {offsets = [0, 0], sizes = [8, 288], strides = [1, 1]} : vector<8x290xf32> to vector<8x288xf32>
    %c0_14 = arith.constant 0 : index
    %c288 = arith.constant 288 : index
    %27 = vector.load %arg4[%c0_14, %c288] : memref<72x576xf32, #tpu.memory_space<vmem>>, vector<8x288xf32>
    tpu.vector_store %arg4[%c0_14, %c288], %26 {strides = array<i32>} : memref<72x576xf32, #tpu.memory_space<vmem>>, vector<8x288xf32>,
    %28 = vector.extract_strided_slice %25 {offsets = [0, 1], sizes = [8, 288], strides = [1, 1]} : vector<8x290xf32> to vector<8x288xf32>
    %c8_15 = arith.constant 8 : index
    %c288_16 = arith.constant 288 : index
    %29 = vector.load %arg4[%c8_15, %c288_16] : memref<72x576xf32, #tpu.memory_space<vmem>>, vector<8x288xf32>
    tpu.vector_store %arg4[%c8_15, %c288_16], %28 {strides = array<i32>} : memref<72x576xf32, #tpu.memory_space<vmem>>, vector<8x288xf32>,
    %30 = vector.extract_strided_slice %25 {offsets = [0, 2], sizes = [8, 288], strides = [1, 1]} : vector<8x290xf32> to vector<8x288xf32>
    %c16_17 = arith.constant 16 : index
    %c288_18 = arith.constant 288 : index
    %31 = vector.load %arg4[%c16_17, %c288_18] : memref<72x576xf32, #tpu.memory_space<vmem>>, vector<8x288xf32>
    tpu.vector_store %arg4[%c16_17, %c288_18], %30 {strides = array<i32>} : memref<72x576xf32, #tpu.memory_space<vmem>>, vector<8x288xf32>,
    %32 = vector.extract_strided_slice %24 {offsets = [0, 18], sizes = [8, 290], strides = [1, 1]} : vector<8x342xf32> to vector<8x290xf32>
    %33 = vector.extract_strided_slice %32 {offsets = [0, 0], sizes = [8, 288], strides = [1, 1]} : vector<8x290xf32> to vector<8x288xf32>
    %c24_19 = arith.constant 24 : index
    %c288_20 = arith.constant 288 : index
    %34 = vector.load %arg4[%c24_19, %c288_20] : memref<72x576xf32, #tpu.memory_space<vmem>>, vector<8x288xf32>
    tpu.vector_store %arg4[%c24_19, %c288_20], %33 {strides = array<i32>} : memref<72x576xf32, #tpu.memory_space<vmem>>, vector<8x288xf32>,
    %35 = vector.extract_strided_slice %32 {offsets = [0, 1], sizes = [8, 288], strides = [1, 1]} : vector<8x290xf32> to vector<8x288xf32>
    %c32_21 = arith.constant 32 : index
    %c288_22 = arith.constant 288 : index
    %36 = vector.load %arg4[%c32_21, %c288_22] : memref<72x576xf32, #tpu.memory_space<vmem>>, vector<8x288xf32>
    tpu.vector_store %arg4[%c32_21, %c288_22], %35 {strides = array<i32>} : memref<72x576xf32, #tpu.memory_space<vmem>>, vector<8x288xf32>,
    %37 = vector.extract_strided_slice %32 {offsets = [0, 2], sizes = [8, 288], strides = [1, 1]} : vector<8x290xf32> to vector<8x288xf32>
    %c40_23 = arith.constant 40 : index
    %c288_24 = arith.constant 288 : index
    %38 = vector.load %arg4[%c40_23, %c288_24] : memref<72x576xf32, #tpu.memory_space<vmem>>, vector<8x288xf32>
    tpu.vector_store %arg4[%c40_23, %c288_24], %37 {strides = array<i32>} : memref<72x576xf32, #tpu.memory_space<vmem>>, vector<8x288xf32>,
    %39 = vector.extract_strided_slice %24 {offsets = [0, 36], sizes = [8, 290], strides = [1, 1]} : vector<8x342xf32> to vector<8x290xf32>
    %40 = vector.extract_strided_slice %39 {offsets = [0, 0], sizes = [8, 288], strides = [1, 1]} : vector<8x290xf32> to vector<8x288xf32>
    %c48_25 = arith.constant 48 : index
    %c288_26 = arith.constant 288 : index
    %41 = vector.load %arg4[%c48_25, %c288_26] : memref<72x576xf32, #tpu.memory_space<vmem>>, vector<8x288xf32>
    tpu.vector_store %arg4[%c48_25, %c288_26], %40 {strides = array<i32>} : memref<72x576xf32, #tpu.memory_space<vmem>>, vector<8x288xf32>,
    %42 = vector.extract_strided_slice %39 {offsets = [0, 1], sizes = [8, 288], strides = [1, 1]} : vector<8x290xf32> to vector<8x288xf32>
    %c56_27 = arith.constant 56 : index
    %c288_28 = arith.constant 288 : index
    %43 = vector.load %arg4[%c56_27, %c288_28] : memref<72x576xf32, #tpu.memory_space<vmem>>, vector<8x288xf32>
    tpu.vector_store %arg4[%c56_27, %c288_28], %42 {strides = array<i32>} : memref<72x576xf32, #tpu.memory_space<vmem>>, vector<8x288xf32>,
    %44 = vector.extract_strided_slice %39 {offsets = [0, 2], sizes = [8, 288], strides = [1, 1]} : vector<8x290xf32> to vector<8x288xf32>
    %c64_29 = arith.constant 64 : index
    %c288_30 = arith.constant 288 : index
    %45 = vector.load %arg4[%c64_29, %c288_30] : memref<72x576xf32, #tpu.memory_space<vmem>>, vector<8x288xf32>
    tpu.vector_store %arg4[%c64_29, %c288_30], %44 {strides = array<i32>} : memref<72x576xf32, #tpu.memory_space<vmem>>, vector<8x288xf32>,
    %c0_31 = arith.constant 0 : index
    %c0_32 = arith.constant 0 : index
    %46 = vector.load %arg2[%c0_31, %c0_32] : memref<8x72xf32, #tpu.memory_space<vmem>>, vector<8x72xf32>
    %c0_33 = arith.constant 0 : index
    %c0_34 = arith.constant 0 : index
    %47 = vector.load %arg4[%c0_33, %c0_34] : memref<72x576xf32, #tpu.memory_space<vmem>>, vector<72x576xf32>
    %cst = arith.constant dense<0.000000e+00> : vector<8x576xf32>
    %48 = tpu.matmul %46, %47, %cst {dimension_numbers = #tpu.dot_dimension_numbers<[1], [0], [0], [1], [0, 0, 1, 1], [], []>} : vector<8x72xf32>, vector<72x576xf32>, vector<8x576xf32> -> vector<8x576xf32>
    %cst_35 = arith.constant 0.000000e+00 : f32
    %49 = vector.broadcast %cst_35 : f32 to vector<8x576xf32>
    %50 = arith.cmpf oge, %48, %49 : vector<8x576xf32>
    %cst_36 = arith.constant 1.000000e-01 : f32
    %51 = vector.broadcast %cst_36 : f32 to vector<8x576xf32>
    %52 = arith.mulf %51, %48 : vector<8x576xf32>
    %53 = arith.select %50, %48, %52 : vector<8x576xi1>, vector<8x576xf32>
    %54 = vector.extract_strided_slice %53 {offsets = [0, 0], sizes = [8, 288], strides = [1, 1]} : vector<8x576xf32> to vector<8x288xf32>
    %c0_37 = arith.constant 0 : index
    %c0_38 = arith.constant 0 : index
    %c0_39 = arith.constant 0 : index
    %55 = vector.load %arg3[%c0_37, %c0_38, %c0_39] : memref<2x8x288xf32, #tpu.memory_space<vmem>>, vector<1x8x288xf32>
    %56 = vector.shape_cast %55 : vector<1x8x288xf32> to vector<8x288xf32>
    %57 = vector.shape_cast %54 : vector<8x288xf32> to vector<1x8x288xf32>
    tpu.vector_store %arg3[%c0_37, %c0_38, %c0_39], %57 {strides = array<i32>} : memref<2x8x288xf32, #tpu.memory_space<vmem>>, vector<1x8x288xf32>,
    %58 = vector.extract_strided_slice %53 {offsets = [0, 288], sizes = [8, 288], strides = [1, 1]} : vector<8x576xf32> to vector<8x288xf32>
    %c1_40 = arith.constant 1 : index
    %c0_41 = arith.constant 0 : index
    %c0_42 = arith.constant 0 : index
    %59 = vector.load %arg3[%c1_40, %c0_41, %c0_42] : memref<2x8x288xf32, #tpu.memory_space<vmem>>, vector<1x8x288xf32>
    %60 = vector.shape_cast %59 : vector<1x8x288xf32> to vector<8x288xf32>
    %61 = vector.shape_cast %58 : vector<8x288xf32> to vector<1x8x288xf32>
    tpu.vector_store %arg3[%c1_40, %c0_41, %c0_42], %61 {strides = array<i32>} : memref<2x8x288xf32, #tpu.memory_space<vmem>>, vector<1x8x288xf32>,
    return
  }
  func.func @transform_0(%arg0: i32) -> (i32, i32, i32) {
    %c0_i32 = arith.constant 0 : i32
    %c0_i32_0 = arith.constant 0 : i32
    %c0_i32_1 = arith.constant 0 : i32
    return %arg0, %c0_i32, %c0_i32_0 : i32, i32, i32
  }
  func.func @transform_1(%arg0: i32) -> (i32, i32) {
    %c0_i32 = arith.constant 0 : i32
    %c0_i32_0 = arith.constant 0 : i32
    %c0_i32_1 = arith.constant 0 : i32
    return %c0_i32, %c0_i32_0 : i32, i32
  }
  func.func @transform_2(%arg0: i32) -> (i32, i32, i32) {
    %c0_i32 = arith.constant 0 : i32
    %c0_i32_0 = arith.constant 0 : i32
    %c0_i32_1 = arith.constant 0 : i32
    return %arg0, %c0_i32, %c0_i32_0 : i32, i32, i32
  }
}

</mosaic_0001>

<bundles_post_ra>
// kernel: _lambda_.1
= control target key start
LH: loop header
LB: loop body
LE: loop exit
PB: predicated region body
PF: predicated region fallthrough
CT: control target
= control target key end

     0   :  { %vm16_vm0 = vcmask 261120   ;;  %s647_s15 = smov 90   ;;  %s648_s16 = smov 91   ;;  %v655_v5 = vmov 0.0   ;;  %vm132_vm1 = vcmask 736256   ;;  %vm117_vm2 = vcmask 744448   ;;  %s804_s0 = inlined_call_operand.vmem [shape: f32[2,8,342], index: 0, kind: input, shape index: {}]   ;;  %s805_s1 = inlined_call_operand.vmem [shape: f32[8,72], index: 1, kind: input, shape index: {}]   ;;  %s806_s2 = inlined_call_operand.vmem [shape: f32[2,8,288], index: 2, kind: output, shape index: {}]  }
   0x1   :  { %v685_v0 = vld [vmem:[%s804_s0 + $0x8] sm:$0xff]  ;;  %v690_v1 = vld [vmem:[%s804_s0] sm:$0xff]  ;;  %v13_v2 = vld [vmem:[%s804_s0 + $0x10] sm:$0xff]  ;;  %s649_s17 = smov 92   ;;  %s650_s18 = smov 108   ;;  %398 = vmatprep.mubr.f32.mxu0 %v655_v5  ;;  %469 = vmatprep.mubr.f32.mxu1 %v655_v5  ;;  %vm102_vm3 = vcmask 752640  }
   0x2   :  { %128 = vrot.lane.b32.xlu0 %v685_v0, %s647_s15  ;;  %126 = vrot.lane.b32.xlu1 %v690_v1, %s647_s15  ;;  %17 = vst.msk [vmem:[#allocation2 + $0x10] sm:$0xff] %vm16_vm0, %v13_v2  ;;  %s651_s19 = smov 109   ;;  %s652_s20 = smov 110   ;;  %v588_v3 = vld [vmem:[%s804_s0 + $0x20] sm:$0xff]  ;;  %v589_v4 = vld [vmem:[%s804_s0 + $0x28] sm:$0xff]  ;;  %vm87_vm4 = vcmask 883712  }
   0x3   :  { %s653_s21 = smov 126   ;;  %s654_s22 = smov 127   ;;  %v587_v6 = vld [vmem:[%s804_s0 + $0x18] sm:$0xff]  ;;  %vm72_vm5 = vcmask 891904   ;;  %vm57_vm6 = vcmask 900096   ;;  %vm42_vm7 = vcmask 1031168  }
   0x4   :  { %s656_s27 = smov 122   ;;  %s657_s30 = smov 123   ;;  %vm27_vm8 = vcmask 1039360   ;;  %vm162_vm9 = vcmask 523264   ;;  %vm275_vm10 = vcmask 998400   ;;  %v735_v49 = vld [vmem:[%s805_s1] sm:$0xff] }
   0x5   :  { %s658_s3 = smov 124   ;;  %s659_s4 = smov 12   ;;  %vm330_vm11 = vcmask 588800   ;;  %vm159_vm12 = vcmask 1047808   ;;  %vm665_vm13 = vmmov 0   ;;  %vm260_vm14 = vcmask 1006592  }
   0x6   :  { %130 = vrot.lane.b32.xlu0 %v13_v2, %s647_s15  ;;  %113 = vrot.lane.b32.xlu1 %v685_v0, %s648_s16  ;;  %s660_s5 = smov 13   ;;  %s661_s6 = smov 14   ;;  %vm245_vm15 = vcmask 1014784  }
   0x7   :  { %s662_s0 = smov 30   ;;  %s663_s7 = smov 31  }
   0x8   :  { %s664_s8 = smov 32   ;;  %s666_s14 = smov 96  }
   0xa   :  { %115 = vrot.lane.b32.xlu0 %v13_v2, %s648_s16  ;;  %111 = vrot.lane.b32.xlu1 %v690_v1, %s648_s16 }
   0xe   :  { %98 = vrot.lane.b32.xlu0 %v685_v0, %s649_s17  ;;  %100 = vrot.lane.b32.xlu1 %v13_v2, %s649_s17 }
  0x12   :  { %96 = vrot.lane.b32.xlu0 %v690_v1, %s649_s17  ;;  %83 = vrot.lane.b32.xlu1 %v685_v0, %s650_s18 }
  0x16   :  { %85 = vrot.lane.b32.xlu0 %v13_v2, %s650_s18  ;;  %81 = vrot.lane.b32.xlu1 %v690_v1, %s650_s18 }
  0x1a   :  { %68 = vrot.lane.b32.xlu0 %v685_v0, %s651_s19  ;;  %70 = vrot.lane.b32.xlu1 %v13_v2, %s651_s19 }
  0x1e   :  { %66 = vrot.lane.b32.xlu0 %v690_v1, %s651_s19  ;;  %53 = vrot.lane.b32.xlu1 %v685_v0, %s652_s20 }
  0x22   :  { %55 = vrot.lane.b32.xlu0 %v13_v2, %s652_s20  ;;  %51 = vrot.lane.b32.xlu1 %v690_v1, %s652_s20 }
  0x26   :  { %38 = vrot.lane.b32.xlu0 %v685_v0, %s653_s21  ;;  %40 = vrot.lane.b32.xlu1 %v13_v2, %s653_s21 }
  0x2a   :  { %36 = vrot.lane.b32.xlu0 %v690_v1, %s653_s21  ;;  %23 = vrot.lane.b32.xlu1 %v685_v0, %s654_s22 }
  0x2e   :  { %25 = vrot.lane.b32.xlu0 %v13_v2, %s654_s22  ;;  %21 = vrot.lane.b32.xlu1 %v690_v1, %s654_s22 }
  0x32   :  { %271 = vrot.lane.b32.xlu0 %v588_v3, %s656_s27  ;;  %273 = vrot.lane.b32.xlu1 %v589_v4, %s656_s27 }
  0x36   :  { %269 = vrot.lane.b32.xlu0 %v587_v6, %s656_s27  ;;  %256 = vrot.lane.b32.xlu1 %v588_v3, %s657_s30 }
  0x3a   :  { %258 = vrot.lane.b32.xlu0 %v589_v4, %s657_s30  ;;  %254 = vrot.lane.b32.xlu1 %v587_v6, %s657_s30 }
  0x3e   :  { %241 = vrot.lane.b32.xlu0 %v588_v3, %s658_s3  ;;  %243 = vrot.lane.b32.xlu1 %v589_v4, %s658_s3 }
  0x42   :  { %239 = vrot.lane.b32.xlu0 %v587_v6, %s658_s3  ;;  %224 = vrot.lane.b32.xlu1 %v587_v6, %s659_s4 }
  0x46   :  { %226 = vrot.lane.b32.xlu0 %v588_v3, %s659_s4  ;;  %209 = vrot.lane.b32.xlu1 %v587_v6, %s660_s5 }
  0x4a   :  { %211 = vrot.lane.b32.xlu0 %v588_v3, %s660_s5  ;;  %228 = vrot.lane.b32.xlu1 %v589_v4, %s659_s4 }
  0x4e   :  { %194 = vrot.lane.b32.xlu0 %v587_v6, %s661_s6  ;;  %196 = vrot.lane.b32.xlu1 %v588_v3, %s661_s6 }
  0x52   :  { %213 = vrot.lane.b32.xlu0 %v589_v4, %s660_s5  ;;  %179 = vrot.lane.b32.xlu1 %v587_v6, %s662_s0 }
  0x56   :  { %181 = vrot.lane.b32.xlu0 %v588_v3, %s662_s0  ;;  %198 = vrot.lane.b32.xlu1 %v589_v4, %s661_s6 }
  0x5a   :  { %164 = vrot.lane.b32.xlu0 %v587_v6, %s663_s7  ;;  %166 = vrot.lane.b32.xlu1 %v588_v3, %s663_s7 }
  0x5e   :  { %183 = vrot.lane.b32.xlu0 %v589_v4, %s662_s0  ;;  %148 = vrot.lane.b32.xlu1 %v587_v6, %s664_s8 }
  0x62   :  { %150 = vrot.lane.b32.xlu0 %v588_v3, %s664_s8  ;;  %168 = vrot.lane.b32.xlu1 %v589_v4, %s663_s7 }
  0x66   :  { %152 = vrot.lane.b32.xlu0 %v589_v4, %s664_s8 }
  0x74   :  { %v129_v7 = vpop.permute.xlu0 %128  ;;  %v127_v8 = vpop.permute.xlu1 %126 }
  0x75   :  { %v133_v9 = vsel %vm132_vm1, %v127_v8, %v129_v7 }
  0x78   :  { %v131_v10 = vpop.permute.xlu0 %130  ;;  %v114_v11 = vpop.permute.xlu1 %113 }
  0x79   :  { %v134_v12 = vsel %vm132_vm1, %v129_v7, %v131_v10  ;;  %140 = vst.msk [vmem:[#allocation2 + $0x150] sm:$0xff] %vm16_vm0, %v131_v10  ;;  %vm230_vm1 = vcmask 97280  }
  0x7a   :  { %348 = vmatprep.subr.mxu0 %v134_v12 }
  0x7b   :  { %349 = vmatpush1.msra.mxu0 %v133_v9 }
  0x7c   :  { %v116_v13 = vpop.permute.xlu0 %115  ;;  %v112_v14 = vpop.permute.xlu1 %111 }
  0x7d   :  { %v119_v15 = vsel %vm117_vm2, %v114_v11, %v116_v13  ;;  %125 = vst.msk [vmem:[#allocation2 + $0x128] sm:$0xff] %vm16_vm0, %v116_v13  ;;  %v118_v16 = vsel %vm117_vm2, %v112_v14, %v114_v11  ;;  %vm215_vm2 = vcmask 105472  }
  0x7e   :  { %350 = vmatprep.subr.mxu0 %v119_v15 }
  0x7f   :  { %351 = vmatpush1.msra.mxu0 %v118_v16 }
  0x80   :  { %v99_v17 = vpop.permute.xlu0 %98  ;;  %v101_v18 = vpop.permute.xlu1 %100 }
  0x81   :  { %v104_v19 = vsel %vm102_vm3, %v99_v17, %v101_v18  ;;  %110 = vst.msk [vmem:[#allocation2 + $0x100] sm:$0xff] %vm16_vm0, %v101_v18 }
  0x82   :  { %352 = vmatprep.subr.mxu0 %v104_v19 }
  0x84   :  { %v97_v20 = vpop.permute.xlu0 %96  ;;  %v84_v21 = vpop.permute.xlu1 %83 }
  0x85   :  { %v103_v22 = vsel %vm102_vm3, %v97_v20, %v99_v17  ;;  %vm200_vm3 = vcmask 113664  }
  0x86   :  { %353 = vmatpush1.msra.mxu0 %v103_v22 }
  0x88   :  { %v86_v23 = vpop.permute.xlu0 %85  ;;  %v82_v24 = vpop.permute.xlu1 %81 }
  0x89   :  { %v89_v25 = vsel %vm87_vm4, %v84_v21, %v86_v23  ;;  %95 = vst.msk [vmem:[#allocation2 + $0xd8] sm:$0xff] %vm16_vm0, %v86_v23  ;;  %v88_v26 = vsel %vm87_vm4, %v82_v24, %v84_v21  ;;  %vm185_vm4 = vcmask 244736  }
  0x8a   :  { %354 = vmatprep.subr.mxu0 %v89_v25 }
  0x8b   :  { %355 = vmatpush1.msra.mxu0 %v88_v26 }
  0x8c   :  { %v69_v27 = vpop.permute.xlu0 %68  ;;  %v71_v28 = vpop.permute.xlu1 %70 }
  0x8d   :  { %v74_v29 = vsel %vm72_vm5, %v69_v27, %v71_v28  ;;  %80 = vst.msk [vmem:[#allocation2 + $0xb0] sm:$0xff] %vm16_vm0, %v71_v28 }
  0x8e   :  { %356 = vmatprep.subr.mxu0 %v74_v29 }
  0x90   :  { %v67_v30 = vpop.permute.xlu0 %66  ;;  %v54_v31 = vpop.permute.xlu1 %53 }
  0x91   :  { %v73_v32 = vsel %vm72_vm5, %v67_v30, %v69_v27  ;;  %vm170_vm5 = vcmask 252928  }
  0x92   :  { %357 = vmatpush1.msra.mxu0 %v73_v32 }
  0x94   :  { %v56_v33 = vpop.permute.xlu0 %55  ;;  %v52_v34 = vpop.permute.xlu1 %51 }
  0x95   :  { %v59_v35 = vsel %vm57_vm6, %v54_v31, %v56_v33  ;;  %65 = vst.msk [vmem:[#allocation2 + $0x88] sm:$0xff] %vm16_vm0, %v56_v33  ;;  %v58_v36 = vsel %vm57_vm6, %v52_v34, %v54_v31 }
  0x96   :  { %358 = vmatprep.subr.mxu0 %v59_v35 }
  0x97   :  { %359 = vmatpush1.msra.mxu0 %v58_v36 }
  0x98   :  { %v39_v37 = vpop.permute.xlu0 %38  ;;  %v41_v38 = vpop.permute.xlu1 %40 }
  0x99   :  { %v44_v39 = vsel %vm42_vm7, %v39_v37, %v41_v38  ;;  %50 = vst.msk [vmem:[#allocation2 + $0x60] sm:$0xff] %vm16_vm0, %v41_v38 }
  0x9a   :  { %360 = vmatprep.subr.mxu0 %v44_v39 }
  0x9c   :  { %v37_v40 = vpop.permute.xlu0 %36  ;;  %v24_v41 = vpop.permute.xlu1 %23 }
  0x9d   :  { %v43_v42 = vsel %vm42_vm7, %v37_v40, %v39_v37 }
  0x9e   :  { %361 = vmatpush1.msra.mxu0 %v43_v42 }
  0xa0   :  { %v26_v43 = vpop.permute.xlu0 %25  ;;  %v22_v44 = vpop.permute.xlu1 %21 }
  0xa1   :  { %v29_v45 = vsel %vm27_vm8, %v24_v41, %v26_v43  ;;  %35 = vst.msk [vmem:[#allocation2 + $0x38] sm:$0xff] %vm16_vm0, %v26_v43  ;;  %v28_v46 = vsel %vm27_vm8, %v22_v44, %v24_v41 }
  0xa2   :  { %362 = vmatprep.subr.mxu0 %v29_v45 }
  0xa3   :  { %363 = vmatpush1.msra.mxu0 %v28_v46 }
  0xa4   :  { %v272_v47 = vpop.permute.xlu0 %271  ;;  %v274_v48 = vpop.permute.xlu1 %273  ;;  %364 = vmatprep.subr.mxu0 %v685_v0 }
  0xa5   :  { %v277_v50 = vsel %vm275_vm10, %v272_v47, %v274_v48  ;;  %283 = vst.msk [vmem:[#allocation2 + $0x160] sm:$0xff] %vm162_vm9, %v274_v48  ;;  %365 = vmatpush1.msra.mxu0 %v690_v1 }
  0xa6   :  { %419 = vmatprep.subr.mxu1 %v277_v50  ;;  %606 = vmatprep.subr.mxu0 %v655_v5 }
  0xa7   :  { %590 = vmatmul.mubr.msk.f32.vlgmr.msra.gmra.mxu0 %vm330_vm11, %v735_v49 }
  0xa8   :  { %v270_v51 = vpop.permute.xlu0 %269  ;;  %v257_v52 = vpop.permute.xlu1 %256  ;;  %624 = vmatprep.mubr.msk.f32.mxu0 %vm665_vm13, %v655_v5 }
  0xa9   :  { %v276_v53 = vsel %vm275_vm10, %v270_v51, %v272_v47 }
  0xaa   :  { %281 = vst.msk [vmem:[#allocation2 + $0x150] sm:$0xff] %vm159_vm12, %v276_v53 }
  0xac   :  { %v259_v54 = vpop.permute.xlu0 %258  ;;  %v255_v55 = vpop.permute.xlu1 %254  ;;  %v329_v56 = vld [vmem:[#allocation2 + $0x160] sm:$0xff] }
  0xad   :  { %v262_v57 = vsel %vm260_vm14, %v257_v52, %v259_v54  ;;  %268 = vst.msk [vmem:[#allocation2 + $0x138] sm:$0xff] %vm162_vm9, %v259_v54  ;;  %v261_v58 = vsel %vm260_vm14, %v255_v55, %v257_v52  ;;  %607 = vmatpush3.msra.mxu0 %v329_v56 }
  0xae   :  { %266 = vst.msk [vmem:[#allocation2 + $0x128] sm:$0xff] %vm159_vm12, %v261_v58  ;;  %608 = vmatprep.subr.mxu0 %v655_v5 }
  0xb0   :  { %v242_v59 = vpop.permute.xlu0 %241  ;;  %v244_v60 = vpop.permute.xlu1 %243 }
  0xb1   :  { %v247_v61 = vsel %vm245_vm15, %v242_v59, %v244_v60  ;;  %253 = vst.msk [vmem:[#allocation2 + $0x110] sm:$0xff] %vm162_vm9, %v244_v60  ;;  %v327_v62 = vld [vmem:[#allocation2 + $0x150] sm:$0xff] }
  0xb2   :  { %420 = vmatpush1.msra.mxu1 %v327_v62 }
  0xb3   :  { %421 = vmatprep.subr.mxu1 %v262_v57 }
  0xb4   :  { %v240_v63 = vpop.permute.xlu0 %239  ;;  %v225_v0 = vpop.permute.xlu1 %224  ;;  %v324_v1 = vld [vmem:[#allocation2 + $0x138] sm:$0xff] }
  0xb5   :  { %v246_v2 = vsel %vm245_vm15, %v240_v63, %v242_v59  ;;  %236 = vst.msk [vmem:[#allocation2 + $0xd8] sm:$0xff] %vm159_vm12, %v225_v0  ;;  %609 = vmatpush3.msra.mxu0 %v324_v1  ;;  %v322_v3 = vld [vmem:[#allocation2 + $0x128] sm:$0xff] }
  0xb6   :  { %251 = vst.msk [vmem:[#allocation2 + $0x100] sm:$0xff] %vm159_vm12, %v246_v2  ;;  %422 = vmatpush1.msra.mxu1 %v322_v3  ;;  %610 = vmatprep.subr.mxu0 %v655_v5 }
  0xb7   :  { %423 = vmatprep.subr.mxu1 %v247_v61 }
  0xb8   :  { %v227_v4 = vpop.permute.xlu0 %226  ;;  %v210_v6 = vpop.permute.xlu1 %209  ;;  %v319_v7 = vld [vmem:[#allocation2 + $0x110] sm:$0xff] }
  0xb9   :  { %v231_v8 = vsel %vm230_vm1, %v225_v0, %v227_v4  ;;  %221 = vst.msk [vmem:[#allocation2 + $0xb0] sm:$0xff] %vm159_vm12, %v210_v6  ;;  %611 = vmatpush3.msra.mxu0 %v319_v7 }
  0xba   :  { %612 = vmatprep.subr.mxu0 %v655_v5 }
  0xbc   :  { %v212_v9 = vpop.permute.xlu0 %211  ;;  %v229_v10 = vpop.permute.xlu1 %228  ;;  %v312_v14 = vld [vmem:[#allocation2 + $0xd8] sm:$0xff] }
  0xbd   :  { %v216_v11 = vsel %vm215_vm2, %v210_v6, %v212_v9  ;;  %v232_v12 = vsel %vm230_vm1, %v227_v4, %v229_v10  ;;  %v317_v13 = vld [vmem:[#allocation2 + $0x100] sm:$0xff] }
  0xbe   :  { %238 = vst.msk [vmem:[#allocation2 + $0xe8] sm:$0xff] %vm162_vm9, %v232_v12  ;;  %424 = vmatpush1.msra.mxu1 %v317_v13 }
  0xbf   :  { %425 = vmatprep.subr.mxu1 %v231_v8 }
  0xc0   :  { %v195_v15 = vpop.permute.xlu0 %194  ;;  %v197_v16 = vpop.permute.xlu1 %196  ;;  %426 = vmatpush1.msra.mxu1 %v312_v14  ;;  %v307_v17 = vld [vmem:[#allocation2 + $0xb0] sm:$0xff] }
  0xc1   :  { %206 = vst.msk [vmem:[#allocation2 + $0x88] sm:$0xff] %vm159_vm12, %v195_v15  ;;  %v201_v18 = vsel %vm200_vm3, %v195_v15, %v197_v16  ;;  %427 = vmatprep.subr.mxu1 %v216_v11 }
  0xc2   :  { %428 = vmatpush1.msra.mxu1 %v307_v17 }
  0xc3   :  { %429 = vmatprep.subr.mxu1 %v201_v18 }
  0xc4   :  { %v214_v19 = vpop.permute.xlu0 %213  ;;  %v180_v20 = vpop.permute.xlu1 %179 }
  0xc5   :  { %v217_v21 = vsel %vm215_vm2, %v212_v9, %v214_v19  ;;  %191 = vst.msk [vmem:[#allocation2 + $0x60] sm:$0xff] %vm159_vm12, %v180_v20  ;;  %v314_v22 = vld [vmem:[#allocation2 + $0xe8] sm:$0xff] }
  0xc6   :  { %223 = vst.msk [vmem:[#allocation2 + $0xc0] sm:$0xff] %vm162_vm9, %v217_v21  ;;  %613 = vmatpush3.msra.mxu0 %v314_v22 }
  0xc7   :  { %614 = vmatprep.subr.mxu0 %v655_v5 }
  0xc8   :  { %v182_v23 = vpop.permute.xlu0 %181  ;;  %v199_v24 = vpop.permute.xlu1 %198  ;;  %v302_v25 = vld [vmem:[#allocation2 + $0x88] sm:$0xff] }
  0xc9   :  { %v186_v26 = vsel %vm185_vm4, %v180_v20, %v182_v23  ;;  %v202_v27 = vsel %vm200_vm3, %v197_v16, %v199_v24  ;;  %430 = vmatpush1.msra.mxu1 %v302_v25 }
  0xca   :  { %208 = vst.msk [vmem:[#allocation2 + $0x98] sm:$0xff] %vm162_vm9, %v202_v27  ;;  %431 = vmatprep.subr.mxu1 %v186_v26 }
  0xcc   :  { %v165_v28 = vpop.permute.xlu0 %164  ;;  %v167_v29 = vpop.permute.xlu1 %166  ;;  %v297_v30 = vld [vmem:[#allocation2 + $0x60] sm:$0xff] }
  0xcd   :  { %176 = vst.msk [vmem:[#allocation2 + $0x38] sm:$0xff] %vm159_vm12, %v165_v28  ;;  %v171_v31 = vsel %vm170_vm5, %v165_v28, %v167_v29  ;;  %v309_v32 = vld [vmem:[#allocation2 + $0xc0] sm:$0xff]  ;;  %432 = vmatpush1.msra.mxu1 %v297_v30 }
  0xce   :  { %615 = vmatpush3.msra.mxu0 %v309_v32  ;;  %433 = vmatprep.subr.mxu1 %v171_v31 }
  0xcf   :  { %616 = vmatprep.subr.mxu0 %v655_v5 }
  0xd0   :  { %v184_v33 = vpop.permute.xlu0 %183  ;;  %v149_v34 = vpop.permute.xlu1 %148 }
  0xd1   :  { %v187_v35 = vsel %vm185_vm4, %v182_v23, %v184_v33  ;;  %160 = vst.msk [vmem:[#allocation2 + $0x10] sm:$0xff] %vm159_vm12, %v149_v34  ;;  %v304_v36 = vld [vmem:[#allocation2 + $0x98] sm:$0xff] }
  0xd2   :  { %193 = vst.msk [vmem:[#allocation2 + $0x70] sm:$0xff] %vm162_vm9, %v187_v35  ;;  %617 = vmatpush3.msra.mxu0 %v304_v36 }
  0xd3   :  { %618 = vmatprep.subr.mxu0 %v655_v5 }
  0xd4   :  { %v151_v37 = vpop.permute.xlu0 %150  ;;  %v169_v38 = vpop.permute.xlu1 %168  ;;  %v292_v39 = vld [vmem:[#allocation2 + $0x38] sm:$0xff] }
  0xd5   :  { %v154_v40 = vsel %vm16_vm0, %v149_v34, %v151_v37  ;;  %v172_v41 = vsel %vm170_vm5, %v167_v29, %v169_v38  ;;  %434 = vmatpush1.msra.mxu1 %v292_v39 }
  0xd6   :  { %178 = vst.msk [vmem:[#allocation2 + $0x48] sm:$0xff] %vm162_vm9, %v172_v41  ;;  %435 = vmatprep.subr.mxu1 %v154_v40 }
  0xd8   :  { %v153_v42 = vpop.permute.xlu0 %152  ;;  %v287_v43 = vld [vmem:[#allocation2 + $0x10] sm:$0xff] }
  0xd9   :  { %v155_v44 = vsel %vm16_vm0, %v151_v37, %v153_v42  ;;  %v299_v45 = vld [vmem:[#allocation2 + $0x70] sm:$0xff]  ;;  %436 = vmatpush1.msra.mxu1 %v287_v43 }
  0xda   :  { %163 = vst.msk [vmem:[#allocation2 + $0x20] sm:$0xff] %vm162_vm9, %v155_v44  ;;  %619 = vmatpush3.msra.mxu0 %v299_v45  ;;  %591 = vmatmul.mubr.msk.f32.vlgmr.msra.gmra.mxu1 %vm330_vm11, %v735_v49 }
  0xdb   :  { %620 = vmatprep.subr.mxu0 %v655_v5 }
  0xdd   :  { %v294_v46 = vld [vmem:[#allocation2 + $0x48] sm:$0xff] }
  0xde   :  { %621 = vmatpush3.msra.mxu0 %v294_v46 }
  0xdf   :  { %622 = vmatprep.subr.mxu0 %v655_v5 }
  0xe1   :  { %v289_v47 = vld [vmem:[#allocation2 + $0x20] sm:$0xff] }
  0xe2   :  { %623 = vmatpush3.msra.mxu0 %v289_v47 }
  0xe3   :  { %625 = vmatmul.mubr.msk.f32.vlgmr.msra.gmra.mxu0 %vm330_vm11, %v735_v49  ;;  %vm573_vm11 = vcmask 785408  }
 0x167   :  { %v400_v48 = vpop.f32.mrf.mxu0 }
 0x168   :  { %vm546_vm6 = vcmp.ge.f32.partialorder %v400_v48, 0.0  ;;  %v551_v50 = vmul.f32 0.1, %v400_v48 }
 0x169   :  { %v402_v51 = vpop.f32.mrf.mxu0 }
 0x16a   :  { %v556_v52 = vsel %vm546_vm6, %v400_v48, %v551_v50  ;;  %vm547_vm7 = vcmp.ge.f32.partialorder %v402_v51, 0.0  ;;  %v552_v53 = vmul.f32 0.1, %v402_v51 }
 0x16b   :  { %561 = vst [vmem:[%s806_s2] sm:$0xff] %v556_v52 }
 0x16c   :  { %v557_v54 = vsel %vm547_vm7, %v402_v51, %v552_v53 }
 0x16d   :  { %562 = vst [vmem:[%s806_s2 + $0x8] sm:$0xff] %v557_v54 }
 0x19a   :  { %v471_v5 = vpop.f32.mrf.mxu1 }
 0x19b   :  { %vm548_vm8 = vcmp.ge.f32.partialorder %v471_v5, 0.0  ;;  %v553_v55 = vmul.f32 0.1, %v471_v5 }
 0x19c   :  { %v473_v49 = vpop.f32.mrf.mxu1 }
 0x19d   :  { %vm549_vm9 = vcmp.ge.f32.partialorder %v473_v49, 0.0  ;;  %v554_v56 = vmul.f32 0.1, %v473_v49  ;;  %v558_v57 = vsel %vm548_vm8, %v471_v5, %v553_v55 }
 0x19e   :  { %567 = vrot.lane.b32.xlu1 %v558_v57, %s666_s14  ;;  %563 = vst.msk [vmem:[%s806_s2 + $0x10] sm:$0xff] %vm16_vm0, %v558_v57 }
 0x19f   :  { %v559_v58 = vsel %vm549_vm9, %v473_v49, %v554_v56 }
 0x1a0   :  { %569 = vrot.lane.b32.xlu0 %v559_v58, %s666_s14 }
 0x1a3   :  { %v542_v59 = vpop.f32.mrf.mxu0 }
 0x1a4   :  { %vm550_vm10 = vcmp.ge.f32.partialorder %v542_v59, 0.0  ;;  %v555_v60 = vmul.f32 0.1, %v542_v59 }
 0x1a5   :  { %v626_v61 = vpop.f32.mrf.mxu0 }
 0x1a6   :  { %v560_v62 = vsel %vm550_vm10, %v542_v59, %v555_v60 }
 0x1a7   :  { %571 = vrot.lane.b32.xlu1 %v560_v62, %s666_s14 }
 0x210   :  { %v568_v63 = vpop.permute.xlu1 %567 }
 0x212   :  { %v570_v0 = vpop.permute.xlu0 %569 }
 0x213   :  { %v574_v1 = vsel %vm573_vm11, %v568_v63, %v570_v0 }
 0x214   :  { %593 = vst [vmem:[%s806_s2 + $0x18] sm:$0xff] %v574_v1 }
 0x219   :  { %v572_v2 = vpop.permute.xlu1 %571 }
 0x21a   :  { %v575_v3 = vsel %vm573_vm11, %v570_v0, %v572_v2  ;;  %595 = vst.msk [vmem:[%s806_s2 + $0x28] sm:$0xff] %vm16_vm0, %v572_v2 }
 0x21b   :  { %594 = vst [vmem:[%s806_s2 + $0x20] sm:$0xff] %v575_v3 }

</bundles_post_ra>
